<compile_context>
chip_gen: v7x
topology: tpu7x:2x2x1
jax: 0.10.0
libtpu: 0.0.40
codegen_flags: <defaults>
</compile_context>

<pallas_src>
import functools

import numpy as np
import jax
import jax.numpy as jnp
from jax.experimental import pallas as pl
from jax.experimental.pallas import tpu as pltpu


# ----------------------------------------------------------------------------
# Pallas kernel: one batch block per grid step.  Everything is a plain 2-D
# tile in the lane-dense [T, bb*P] layout; four MXU matmuls, no transposes,
# no reshapes, unmasked stores.
#
# Per-sample algebra (all tensors kept transposed, i.e. [T, .]):
#   y'  = dct @ x_b                          (temporal DCT)
#   s'  = (w^T @ y') @ adj^T                 == (adj @ y'^T @ w)^T
#   g'  = tanh(s' + bias^T) + y'             (residual in DCT domain)
#   out = idct @ g'
# Batch is folded onto the lane axis; the shared adjacency is applied to all
# samples at once through the block-diagonal kron(I_bb, adj^T).
# ----------------------------------------------------------------------------
def _dct_gcn_kernel(x_ref, dct_ref, wt_ref, idct_ref, adj_bd_t_ref, bias_ref,
                    o_ref):
    xs = x_ref[...]                                             # [T, bb*P]

    # Stage 1: DCT over time for every (sample, joint) column.
    y = jnp.dot(dct_ref[...], xs, preferred_element_type=jnp.float32)

    # Stage 2: feature mix (w^T) then graph conv via block-diag adj^T.
    u = jnp.dot(wt_ref[...], y, preferred_element_type=jnp.float32)
    s = jnp.dot(u, adj_bd_t_ref[...], preferred_element_type=jnp.float32)

    # Stage 3: nonlinearity + residual (in DCT domain), then inverse DCT.
    g = jnp.tanh(s + bias_ref[...]) + y
    o = jnp.dot(idct_ref[...], g, preferred_element_type=jnp.float32)
    o_ref[...] = o.astype(o_ref.dtype)


# ----------------------------------------------------------------------------
# One-time parameter precompute (hoisted out of the forward path).
# ----------------------------------------------------------------------------
def choose_batch_block(B, P):
    """Smallest divisor bb of B with bb*P % 128 == 0 and (if possible) >= 2
    grid steps; falls back to the whole batch (block == full array is always
    a legal BlockSpec)."""
    divisors = [d for d in range(1, B + 1) if B % d == 0]
    aligned = [d for d in divisors if (d * P) % 128 == 0]
    for d in aligned:
        if B // d >= 2:
            return d
    if aligned:
        return aligned[0]
    return B


def precompute_params(dct_m, idct_m, adj, w, bias, batch_block):
    """Model constants in kernel layout.  Call once; reuse across forwards."""
    params = {
        "dct": dct_m,                                               # [T, T]
        "wt": w.T,                                                  # [T, T]
        "idct": idct_m,                                             # [T, T]
        "adj_bd_t": jnp.kron(
            jnp.eye(batch_block, dtype=adj.dtype), adj.T),          # [bb*P, bb*P]
        "bias_t": jnp.tile(bias.T, (1, batch_block)),               # [T, bb*P]
    }
    return jax.tree_util.tree_map(jax.block_until_ready, params)


# ----------------------------------------------------------------------------
# Forward passes.
# ----------------------------------------------------------------------------
def _forward_slab(x_slab, params, batch_block):
    """x_slab: [T, B*P] (sample b occupies lane columns [b*P, (b+1)*P))."""
    T, BP_total = x_slab.shape
    bbP = params["bias_t"].shape[1]
    assert BP_total % bbP == 0
    nblk = BP_total // bbP
    del batch_block  # encoded in the precomputed params' shapes

    const2d = lambda shape: pl.BlockSpec(shape, lambda i: (0, 0))

    return pl.pallas_call(
        _dct_gcn_kernel,
        out_shape=jax.ShapeDtypeStruct((T, BP_total), x_slab.dtype),
        grid=(nblk,),
        in_specs=[
            pl.BlockSpec((T, bbP), lambda i: (0, i)),   # x slab (lane-dense)
            const2d((T, T)),                            # dct
            const2d((T, T)),                            # w^T
            const2d((T, T)),                            # idct
            const2d((bbP, bbP)),                        # block-diag adj^T
            const2d((T, bbP)),                          # tiled bias^T
        ],
        out_specs=pl.BlockSpec((T, bbP), lambda i: (0, i)),
        compiler_params=pltpu.CompilerParams(
            dimension_semantics=("parallel",)),         # v7x: 2-TC sharding
    )(x_slab, params["dct"], params["wt"], params["idct"],
      params["adj_bd_t"], params["bias_t"])


# Zero-transpose entry point for callers that keep the slab layout.
dct_gcn_forward_slab = jax.jit(
    _forward_slab, static_argnames=("batch_block",))


@functools.partial(jax.jit, static_argnames=("batch_block",))
def dct_gcn_forward(x, params, *, batch_block):
    """x: [B, T, P] -> out: [B, T, P].  Layout plumbing fused inside the jit."""
    B, T, P = x.shape
    x_slab = jnp.transpose(x, (1, 0, 2)).reshape(T, B * P)      # [T, B*P]
    out_slab = _forward_slab(x_slab, params, batch_block)
    return out_slab.reshape(T, B, P).transpose(1, 0, 2)


# ----------------------------------------------------------------------------
# Deterministic parameter construction (synthetic — no checkpoint loading).
# ----------------------------------------------------------------------------
def make_dct_matrices(T):
    """Orthonormal DCT-II matrix and its inverse (transpose)."""
    n = np.arange(T)
    k = n.reshape(-1, 1)
    m = np.sqrt(2.0 / T) * np.cos(np.pi * (2 * n + 1) * k / (2 * T))
    m[0, :] = np.sqrt(1.0 / T)
    dct = jnp.asarray(m, dtype=jnp.float32)
    idct = jnp.asarray(m.T, dtype=jnp.float32)
    return dct, idct


def reference_forward(x, dct_m, idct_m, adj, w, bias):
    y = jnp.einsum("tu,bup->btp", dct_m, x)
    yt = jnp.swapaxes(y, 1, 2)                       # [B, P, T]
    h = jnp.einsum("pq,bqt->bpt", adj, yt)
    h = jnp.einsum("bpt,tu->bpu", h, w)
    h = jnp.tanh(h + bias[None]) + yt
    out = jnp.einsum("tu,bpu->btp", idct_m, h)
    return out


if __name__ == "__main__":
    # batch, seq_len, pose_size.  B*P chosen so the lane-aligned batch block
    # exists: bb=16 -> bb*P=384 (multiple of 128), grid=(2,).
    B, T, P = 32, 16, 24

    key = jax.random.PRNGKey(0)
    kx, ka, kw, kb = jax.random.split(key, 4)

    x = jax.random.normal(kx, (B, T, P), dtype=jnp.float32)
    adj = jax.random.normal(ka, (P, P), dtype=jnp.float32) * (1.0 / np.sqrt(P))
    w = jax.random.normal(kw, (T, T), dtype=jnp.float32) * (1.0 / np.sqrt(T))
    bias = jax.random.normal(kb, (P, T), dtype=jnp.float32) * 0.1
    dct_m, idct_m = make_dct_matrices(T)

    # One-time (hoisted) constant precompute; the hot path below is a single
    # jitted call: transpose + one pallas_call + un-stack.
    bb = choose_batch_block(B, P)
    params = precompute_params(dct_m, idct_m, adj, w, bias, bb)

    out = dct_gcn_forward(x, params, batch_block=bb)
    out = jax.block_until_ready(out)

    ref = reference_forward(x, dct_m, idct_m, adj, w, bias)
    np.testing.assert_allclose(np.asarray(out), np.asarray(ref),
                               rtol=1e-4, atol=1e-4)

    print("KERNEL_OK")
</pallas_src>

<mosaic_0001>
module attributes {stable_mosaic.version = 11 : i64} {
  func.func @_dct_gcn_kernel(%arg0: i32, %arg1: memref<16x384xf32, #tpu.memory_space<vmem>>, %arg2: memref<16x16xf32, #tpu.memory_space<vmem>>, %arg3: memref<16x16xf32, #tpu.memory_space<vmem>>, %arg4: memref<16x16xf32, #tpu.memory_space<vmem>>, %arg5: memref<384x384xf32, #tpu.memory_space<vmem>>, %arg6: memref<16x384xf32, #tpu.memory_space<vmem>>, %arg7: memref<16x384xf32, #tpu.memory_space<vmem>>) attributes {dimension_semantics = [#tpu.dimension_semantics<parallel>], iteration_bounds = array<i64: 2>, scalar_prefetch = 0 : i64, scratch_operands = 0 : i64, tpu.core_type = #tpu.core_type<tc>, window_params = [{transform_indices = @transform_0, window_bounds = array<i64: 16, 384>}, {pipeline_mode = #tpu.pipeline_mode<synchronous>, transform_indices = @transform_1, window_bounds = array<i64: 16, 16>}, {pipeline_mode = #tpu.pipeline_mode<synchronous>, transform_indices = @transform_2, window_bounds = array<i64: 16, 16>}, {pipeline_mode = #tpu.pipeline_mode<synchronous>, transform_indices = @transform_3, window_bounds = array<i64: 16, 16>}, {pipeline_mode = #tpu.pipeline_mode<synchronous>, transform_indices = @transform_4, window_bounds = array<i64: 384, 384>}, {pipeline_mode = #tpu.pipeline_mode<synchronous>, transform_indices = @transform_5, window_bounds = array<i64: 16, 384>}, {transform_indices = @transform_6, window_bounds = array<i64: 16, 384>}]} {
    %c0 = arith.constant 0 : index
    %c0_0 = arith.constant 0 : index
    %0 = vector.load %arg1[%c0, %c0_0] : memref<16x384xf32, #tpu.memory_space<vmem>>, vector<16x384xf32>
    %c0_1 = arith.constant 0 : index
    %c0_2 = arith.constant 0 : index
    %1 = vector.load %arg2[%c0_1, %c0_2] : memref<16x16xf32, #tpu.memory_space<vmem>>, vector<16x16xf32>
    %cst = arith.constant dense<0.000000e+00> : vector<16x384xf32>
    %2 = tpu.matmul %1, %0, %cst {dimension_numbers = #tpu.dot_dimension_numbers<[1], [0], [0], [1], [0, 0, 1, 1], [], []>} : vector<16x16xf32>, vector<16x384xf32>, vector<16x384xf32> -> vector<16x384xf32>
    %c0_3 = arith.constant 0 : index
    %c0_4 = arith.constant 0 : index
    %3 = vector.load %arg3[%c0_3, %c0_4] : memref<16x16xf32, #tpu.memory_space<vmem>>, vector<16x16xf32>
    %cst_5 = arith.constant dense<0.000000e+00> : vector<16x384xf32>
    %4 = tpu.matmul %3, %2, %cst_5 {dimension_numbers = #tpu.dot_dimension_numbers<[1], [0], [0], [1], [0, 0, 1, 1], [], []>} : vector<16x16xf32>, vector<16x384xf32>, vector<16x384xf32> -> vector<16x384xf32>
    %c0_6 = arith.constant 0 : index
    %c0_7 = arith.constant 0 : index
    %5 = vector.load %arg5[%c0_6, %c0_7] : memref<384x384xf32, #tpu.memory_space<vmem>>, vector<384x384xf32>
    %cst_8 = arith.constant dense<0.000000e+00> : vector<16x384xf32>
    %6 = tpu.matmul %4, %5, %cst_8 {dimension_numbers = #tpu.dot_dimension_numbers<[1], [0], [0], [1], [0, 0, 1, 1], [], []>} : vector<16x384xf32>, vector<384x384xf32>, vector<16x384xf32> -> vector<16x384xf32>
    %c0_9 = arith.constant 0 : index
    %c0_10 = arith.constant 0 : index
    %7 = vector.load %arg6[%c0_9, %c0_10] : memref<16x384xf32, #tpu.memory_space<vmem>>, vector<16x384xf32>
    %8 = arith.addf %6, %7 : vector<16x384xf32>
    %9 = math.tanh %8 : vector<16x384xf32>
    %10 = arith.addf %9, %2 : vector<16x384xf32>
    %c0_11 = arith.constant 0 : index
    %c0_12 = arith.constant 0 : index
    %11 = vector.load %arg4[%c0_11, %c0_12] : memref<16x16xf32, #tpu.memory_space<vmem>>, vector<16x16xf32>
    %cst_13 = arith.constant dense<0.000000e+00> : vector<16x384xf32>
    %12 = tpu.matmul %11, %10, %cst_13 {dimension_numbers = #tpu.dot_dimension_numbers<[1], [0], [0], [1], [0, 0, 1, 1], [], []>} : vector<16x16xf32>, vector<16x384xf32>, vector<16x384xf32> -> vector<16x384xf32>
    %c0_14 = arith.constant 0 : index
    %c0_15 = arith.constant 0 : index
    %13 = vector.load %arg7[%c0_14, %c0_15] : memref<16x384xf32, #tpu.memory_space<vmem>>, vector<16x384xf32>
    tpu.vector_store %arg7[%c0_14, %c0_15], %12 {strides = array<i32>} : memref<16x384xf32, #tpu.memory_space<vmem>>, vector<16x384xf32>,
    return
  }
  func.func @transform_0(%arg0: i32) -> (i32, i32) {
    %c0_i32 = arith.constant 0 : i32
    %c0_i32_0 = arith.constant 0 : i32
    return %c0_i32, %arg0 : i32, i32
  }
  func.func @transform_1(%arg0: i32) -> (i32, i32) {
    %c0_i32 = arith.constant 0 : i32
    %c0_i32_0 = arith.constant 0 : i32
    %c0_i32_1 = arith.constant 0 : i32
    return %c0_i32, %c0_i32_0 : i32, i32
  }
  func.func @transform_2(%arg0: i32) -> (i32, i32) {
    %c0_i32 = arith.constant 0 : i32
    %c0_i32_0 = arith.constant 0 : i32
    %c0_i32_1 = arith.constant 0 : i32
    return %c0_i32, %c0_i32_0 : i32, i32
  }
  func.func @transform_3(%arg0: i32) -> (i32, i32) {
    %c0_i32 = arith.constant 0 : i32
    %c0_i32_0 = arith.constant 0 : i32
    %c0_i32_1 = arith.constant 0 : i32
    return %c0_i32, %c0_i32_0 : i32, i32
  }
  func.func @transform_4(%arg0: i32) -> (i32, i32) {
    %c0_i32 = arith.constant 0 : i32
    %c0_i32_0 = arith.constant 0 : i32
    %c0_i32_1 = arith.constant 0 : i32
    return %c0_i32, %c0_i32_0 : i32, i32
  }
  func.func @transform_5(%arg0: i32) -> (i32, i32) {
    %c0_i32 = arith.constant 0 : i32
    %c0_i32_0 = arith.constant 0 : i32
    %c0_i32_1 = arith.constant 0 : i32
    return %c0_i32, %c0_i32_0 : i32, i32
  }
  func.func @transform_6(%arg0: i32) -> (i32, i32) {
    %c0_i32 = arith.constant 0 : i32
    %c0_i32_0 = arith.constant 0 : i32
    return %c0_i32, %arg0 : i32, i32
  }
}

</mosaic_0001>

<bundles_post_ra>
// kernel: dct_gcn_forward.1
= control target key start
LH: loop header
LB: loop body
LE: loop exit
PB: predicated region body
PF: predicated region fallthrough
CT: control target
= control target key end

     0   :  { %s1768_s21 = smov 0   ;;  %s1770_s22 = smov 0   ;;  %s2348_s0 = inlined_call_operand.vmem [shape: f32[16,768], index: 0, kind: input, shape index: {}]   ;;  %s2349_s1 = inlined_call_operand.vmem [shape: f32[16,16], index: 1, kind: input, shape index: {}]   ;;  %s2350_s2 = inlined_call_operand.vmem [shape: f32[16,16], index: 2, kind: input, shape index: {}]   ;;  %s2351_s3 = inlined_call_operand.vmem [shape: f32[16,16], index: 3, kind: input, shape index: {}]   ;;  %s2352_s4 = inlined_call_operand.vmem [shape: f32[384,384], index: 4, kind: input, shape index: {}]   ;;  %s2353_s5 = inlined_call_operand.vmem [shape: f32[16,384], index: 5, kind: input, shape index: {}]   ;;  %s2354_s6 = inlined_call_operand.vmem [shape: f32[16,768], index: 6, kind: output, shape index: {}]  }
   0x1   :  { %s1772_s23 = smov 0  }
   0x2 LB: > { %s1330_s24 = sadd.s32 4294967295, %s1730_s23   ;;  %s1785_s25 = sadd.s32 1, %s1730_s23   ;;  %s1730_s23 = sphi %s1772_s23, %s2358_s23   ;;  %s1726_s22 = sphi %s1770_s22, %s2357_s22   ;;  %s1722_s21 = sphi %s1768_s21, %s2356_s21  }
   0x3   : > { %s20_s26 = ssub.s32 %s1730_s23, %s1785_s25  ;;  %s23_s27 = sadd.s32 1, %s1726_s22 }
   0x4   : > { %p21_p0 = scmp.eq.s32.totalorder %s20_s26, 0  ;;  %p30_p1 = scmp.ne.s32.totalorder %s1726_s22, %s1722_s21 }
   0x5   : > { %p31_p2 = scmp.eq.s32.totalorder %s1730_s23, 0  ;;  %p165_p3 = scmp.eq.s32.totalorder %s1330_s24, 1 }
   0x6   : > { %s1796_s28 = scalar_select %p21_p0, %s1726_s22, %s23_s27  }
   0x7   : > { %p32_p4 = por %p31_p2, %p30_p1  ;;  %p1798_p5 = por %p165_p3, %p30_p1 }
   0x8   : > { %p1333_p6 = scmp.ge.s32.totalorder %s1730_s23, 2 }
   0xa   : > { %202 = sbr.rel (%p1333_p6) target bundleno = 25 (0x19), region = 36 }
  0x11   : > { %205 = sbr.rel (!%p32_p4) target bundleno = 25 (0x19), region = 40  ;;  %s207_s30 = sand.u32 (%p32_p4), 1, %s1726_s22  }
  0x12   : > { %s1351_s7 = smul.u32 (%p32_p4), 24, %s1730_s23 }
  0x13   : > { %s1669_s8 = smul.u32 (%p32_p4), 48, %s207_s30 }
  0x14   : > { %s212_s11 = scalar_lea.vmem (%p32_p4), %s2348_s0, %s1351_s7 }
  0x15   : > { %v225_v0 = vld [vmem:[%s212_s11] sm:$0xff] (%p32_p4)  ;;  %v227_v1 = vld [vmem:[%s212_s11 + $0x8] sm:$0xff] (%p32_p4)  ;;  %v229_v2 = vld [vmem:[%s212_s11 + $0x10] sm:$0xff] (%p32_p4)  ;;  %s209_s12 = scalar_lea.vmem (%p32_p4), [#allocation2], %s1669_s8 }
  0x16   : > { %226 = vst [vmem:[%s209_s12] sm:$0xff] (%p32_p4), %v225_v0  ;;  %228 = vst [vmem:[%s209_s12 + $0x8] sm:$0xff] (%p32_p4), %v227_v1  ;;  %v231_v3 = vld [vmem:[%s212_s11 + $0x30] sm:$0xff] (%p32_p4)  ;;  %v233_v4 = vld [vmem:[%s212_s11 + $0x38] sm:$0xff] (%p32_p4) }
  0x17   : > { %230 = vst [vmem:[%s209_s12 + $0x10] sm:$0xff] (%p32_p4), %v229_v2  ;;  %v235_v5 = vld [vmem:[%s212_s11 + $0x40] sm:$0xff] (%p32_p4)  ;;  %232 = vst [vmem:[%s209_s12 + $0x18] sm:$0xff] (%p32_p4), %v231_v3 }
  0x18   : > { %234 = vst [vmem:[%s209_s12 + $0x20] sm:$0xff] %v233_v4  ;;  %236 = vst [vmem:[%s209_s12 + $0x28] sm:$0xff] %v235_v5 }
  0x19 PF: > { %p1335_p7 = scmp.ge.s32.totalorder %s1730_s23, 1  ;;  %p241_p8 = scmp.lt.s32.totalorder %s1730_s23, 3 }
  0x1b   : > { %p242_p9 = pnand %p1335_p7, %p241_p8 }
  0x1c   : > { %s248_s13 = sand.u32 (!%p242_p9), 1, %s1722_s21   ;;  %v1732_v6 = vmov (!%p242_p9), 0.0   ;;  %v284_v16 = vld [vmem:[%s2349_s1] sm:$0xff] (!%p242_p9)  ;;  %vm286_vm0 = vcmask (!%p242_p9), 130048   ;;  %v285_v17 = vld [vmem:[%s2349_s1 + $0x8] sm:$0xff] (!%p242_p9)  ;;  %v608_v22 = vld [vmem:[%s2352_s4 + $0x18] sm:$0xff] (!%p242_p9) }
  0x1d   : > { %245 = sbr.rel (%p242_p9) target bundleno = 977 (0x3d1), region = 63  ;;  %357 = vmatprep.mubr.f32.mxu0 (!%p242_p9), %v1732_v6  ;;  %v606_v18 = vld [vmem:[%s2352_s4 + $0x8] sm:$0xff] (!%p242_p9)  ;;  %v609_v19 = vld [vmem:[%s2352_s4 + $0x20] sm:$0xff] (!%p242_p9)  ;;  %v612_v23 = vld [vmem:[%s2352_s4 + $0x38] sm:$0xff] (!%p242_p9) }
  0x1e   : > { %s1811_s14 = smul.u32 (!%p242_p9), 48, %s248_s13  ;;  %v605_v20 = vld [vmem:[%s2352_s4] sm:$0xff] (!%p242_p9)  ;;  %v1493_v21 = vpack.c.bf16 (!%p242_p9), %v609_v19, %v606_v18  ;;  %v615_v24 = vld [vmem:[%s2352_s4 + $0x50] sm:$0xff] (!%p242_p9)  ;;  %v614_v28 = vld [vmem:[%s2352_s4 + $0x48] sm:$0xff] (!%p242_p9) }
  0x1f   : > { %v1495_v25 = vpack.c.bf16 (!%p242_p9), %v608_v22, %v605_v20  ;;  %v1497_v26 = vpack.c.bf16 (!%p242_p9), %v615_v24, %v612_v23  ;;  %v611_v27 = vld [vmem:[%s2352_s4 + $0x30] sm:$0xff] (!%p242_p9)  ;;  %v618_v29 = vld [vmem:[%s2352_s4 + $0x68] sm:$0xff] (!%p242_p9)  ;;  %v621_v30 = vld [vmem:[%s2352_s4 + $0x80] sm:$0xff] (!%p242_p9) }
  0x20   : > { %s250_s15 = scalar_lea.vmem (!%p242_p9), [#allocation2], %s1811_s14  ;;  %1494 = vmatprep.subr.bf16.mxu1 (!%p242_p9), %v1493_v21  ;;  %v1499_v31 = vpack.c.bf16 (!%p242_p9), %v614_v28, %v611_v27  ;;  %v1501_v32 = vpack.c.bf16 (!%p242_p9), %v621_v30, %v618_v29  ;;  %v617_v33 = vld [vmem:[%s2352_s4 + $0x60] sm:$0xff] (!%p242_p9)  ;;  %v620_v34 = vld [vmem:[%s2352_s4 + $0x78] sm:$0xff] (!%p242_p9)  ;;  %v627_v36 = vld [vmem:[%s2352_s4 + $0xb0] sm:$0xff] (!%p242_p9)  ;;  %s275_s26 = scalar_lea.vmem (!%p242_p9), [#allocation3], %s1811_s14 }
  0x21   : > { %v279_v7 = vld [vmem:[%s250_s15 + $0x8] sm:$0xff] (!%p242_p9)  ;;  %v282_v8 = vld [vmem:[%s250_s15 + $0x20] sm:$0xff] (!%p242_p9)  ;;  %v281_v11 = vld [vmem:[%s250_s15 + $0x18] sm:$0xff] (!%p242_p9)  ;;  %1496 = vmatpush1.bf16.msra.mxu1 (!%p242_p9), %v1495_v25  ;;  %v1503_v37 = vpack.c.bf16 (!%p242_p9), %v620_v34, %v617_v33 }
  0x22   : > { %v278_v9 = vld [vmem:[%s250_s15] sm:$0xff] (!%p242_p9)  ;;  %v1477_v10 = vpack.c.bf16 (!%p242_p9), %v282_v8, %v279_v7  ;;  %v280_v12 = vld [vmem:[%s250_s15 + $0x10] sm:$0xff] (!%p242_p9)  ;;  %v283_v13 = vld [vmem:[%s250_s15 + $0x28] sm:$0xff] (!%p242_p9)  ;;  %1498 = vmatprep.subr.bf16.mxu1 (!%p242_p9), %v1497_v26 }
  0x23   : > { %v1479_v14 = vpack.c.bf16 (!%p242_p9), %v281_v11, %v278_v9  ;;  %v1481_v15 = vpack.c.bf16 (!%p242_p9), %v283_v13, %v280_v12  ;;  %v624_v35 = vld [vmem:[%s2352_s4 + $0x98] sm:$0xff] (!%p242_p9)  ;;  %v623_v39 = vld [vmem:[%s2352_s4 + $0x90] sm:$0xff] (!%p242_p9)  ;;  %v626_v40 = vld [vmem:[%s2352_s4 + $0xa8] sm:$0xff] (!%p242_p9) }
  0x24   : > { %1478 = vmatprep.subr.bf16.mxu0 %v1477_v10  ;;  %v1505_v38 = vpack.c.bf16 %v627_v36, %v624_v35  ;;  %v630_v41 = vld [vmem:[%s2352_s4 + $0xc8] sm:$0xff]  ;;  %v633_v42 = vld [vmem:[%s2352_s4 + $0xe0] sm:$0xff]  ;;  %v1507_v43 = vpack.c.bf16 %v626_v40, %v623_v39  ;;  %v632_v46 = vld [vmem:[%s2352_s4 + $0xd8] sm:$0xff]  ;;  %s1352_s27 = smul.u32 (%p1798_p5), 24, %s1330_s24 }
  0x25   : > { %1480 = vmatpush1.bf16.msra.mxu0 %v1479_v14  ;;  %1500 = vmatpush1.bf16.msra.mxu1 %v1499_v31  ;;  %v1509_v44 = vpack.c.bf16 %v633_v42, %v630_v41  ;;  %v629_v45 = vld [vmem:[%s2352_s4 + $0xc0] sm:$0xff]  ;;  %v636_v47 = vld [vmem:[%s2352_s4 + $0xf8] sm:$0xff]  ;;  %v639_v48 = vld [vmem:[%s2352_s4 + $0x110] sm:$0xff] }
  0x26   : > { %1482 = vmatprep.subr.bf16.mxu0 %v1481_v15  ;;  %1502 = vmatprep.subr.bf16.mxu1 %v1501_v32  ;;  %v1511_v49 = vpack.c.bf16 %v632_v46, %v629_v45  ;;  %v1513_v50 = vpack.c.bf16 %v639_v48, %v636_v47  ;;  %v635_v51 = vld [vmem:[%s2352_s4 + $0xf0] sm:$0xff]  ;;  %v638_v52 = vld [vmem:[%s2352_s4 + $0x108] sm:$0xff]  ;;  %v645_v54 = vld [vmem:[%s2352_s4 + $0x140] sm:$0xff]  ;;  %s1246_s7 = scalar_lea.vmem (%p1798_p5), %s2354_s6, %s1352_s27 }
  0x27   : > { %v642_v53 = vld [vmem:[%s2352_s4 + $0x128] sm:$0xff]  ;;  %v1515_v55 = vpack.c.bf16 %v638_v52, %v635_v51  ;;  %v641_v57 = vld [vmem:[%s2352_s4 + $0x120] sm:$0xff]  ;;  %v644_v58 = vld [vmem:[%s2352_s4 + $0x138] sm:$0xff] }
  0x28   : > { %1336 = vmatmul.mubr.msk.f32.vlgmr.msra.gmra.mrb[0].mxu0 %vm286_vm0, %v284_v16  ;;  %v1517_v56 = vpack.c.bf16 %v645_v54, %v642_v53  ;;  %v648_v59 = vld [vmem:[%s2352_s4 + $0x158] sm:$0xff]  ;;  %v651_v60 = vld [vmem:[%s2352_s4 + $0x170] sm:$0xff]  ;;  %v1519_v61 = vpack.c.bf16 %v644_v58, %v641_v57  ;;  %v650_v0 = vld [vmem:[%s2352_s4 + $0x168] sm:$0xff] }
  0x29   : > { %363 = vmatprep.mubr.f32.mxu0 %v1732_v6  ;;  %1484 = vmatpush3.bf16.msra.mxu0 %v1481_v15  ;;  %v1521_v62 = vpack.c.bf16 %v651_v60, %v648_v59  ;;  %v647_v63 = vld [vmem:[%s2352_s4 + $0x150] sm:$0xff]  ;;  %v654_v1 = vld [vmem:[%s2352_s4 + $0x188] sm:$0xff]  ;;  %v657_v2 = vld [vmem:[%s2352_s4 + $0x1a0] sm:$0xff] }
  0x2a   : > { %1504 = vmatpush1.bf16.msra.mxu1 %v1503_v37  ;;  %v1523_v3 = vpack.c.bf16 %v650_v0, %v647_v63  ;;  %v1525_v4 = vpack.c.bf16 %v657_v2, %v654_v1  ;;  %v653_v5 = vld [vmem:[%s2352_s4 + $0x180] sm:$0xff]  ;;  %v656_v7 = vld [vmem:[%s2352_s4 + $0x198] sm:$0xff]  ;;  %v663_v9 = vld [vmem:[%s2352_s4 + $0x1d0] sm:$0xff] }
  0x2b   : > { %1506 = vmatprep.subr.bf16.mxu1 %v1505_v38  ;;  %v660_v8 = vld [vmem:[%s2352_s4 + $0x1b8] sm:$0xff]  ;;  %v1527_v10 = vpack.c.bf16 %v656_v7, %v653_v5  ;;  %v659_v12 = vld [vmem:[%s2352_s4 + $0x1b0] sm:$0xff]  ;;  %v662_v13 = vld [vmem:[%s2352_s4 + $0x1c8] sm:$0xff] }
  0x2c   : > { %1337 = vmatmul.mubr.msk.f32.gmra.mrb[2].mxu0 %vm286_vm0, %v285_v17  ;;  %v1529_v11 = vpack.c.bf16 %v663_v9, %v660_v8  ;;  %v666_v14 = vld [vmem:[%s2352_s4 + $0x1e8] sm:$0xff]  ;;  %v669_v15 = vld [vmem:[%s2352_s4 + $0x200] sm:$0xff]  ;;  %v668_v19 = vld [vmem:[%s2352_s4 + $0x1f8] sm:$0xff] }
  0x2d   : > { %1425 = vmatprep.mubr.msk.f32.mxu0 %vm286_vm0, %v284_v16  ;;  %v1531_v16 = vpack.c.bf16 %v662_v13, %v659_v12  ;;  %v665_v18 = vld [vmem:[%s2352_s4 + $0x1e0] sm:$0xff]  ;;  %v672_v20 = vld [vmem:[%s2352_s4 + $0x218] sm:$0xff]  ;;  %v675_v21 = vld [vmem:[%s2352_s4 + $0x230] sm:$0xff] }
  0x2e   : > { %1508 = vmatpush1.bf16.msra.mxu1 %v1507_v43  ;;  %v1535_v22 = vpack.c.bf16 %v668_v19, %v665_v18  ;;  %v1537_v23 = vpack.c.bf16 %v675_v21, %v672_v20  ;;  %v671_v24 = vld [vmem:[%s2352_s4 + $0x210] sm:$0xff]  ;;  %v674_v25 = vld [vmem:[%s2352_s4 + $0x228] sm:$0xff]  ;;  %v681_v27 = vld [vmem:[%s2352_s4 + $0x260] sm:$0xff] }
  0x2f   : > { %1510 = vmatprep.subr.bf16.mxu1 %v1509_v44  ;;  %v678_v26 = vld [vmem:[%s2352_s4 + $0x248] sm:$0xff]  ;;  %v1539_v28 = vpack.c.bf16 %v674_v25, %v671_v24  ;;  %v677_v30 = vld [vmem:[%s2352_s4 + $0x240] sm:$0xff]  ;;  %v680_v31 = vld [vmem:[%s2352_s4 + $0x258] sm:$0xff] }
  0x30   : > { %1426 = vmatmul.mubr.msk.f32.vlgmr.msra.gmra.mrb[4].mxu0 %vm286_vm0, %v285_v17  ;;  %v1533_v17 = vpack.c.bf16 %v669_v15, %v666_v14  ;;  %v1541_v29 = vpack.c.bf16 %v681_v27, %v678_v26  ;;  %v684_v32 = vld [vmem:[%s2352_s4 + $0x278] sm:$0xff]  ;;  %v687_v33 = vld [vmem:[%s2352_s4 + $0x290] sm:$0xff]  ;;  %v1543_v34 = vpack.c.bf16 %v680_v31, %v677_v30  ;;  %v686_v37 = vld [vmem:[%s2352_s4 + $0x288] sm:$0xff] }
  0x31   : > { %517 = vmatprep.mubr.f32.mxu0 %v1732_v6  ;;  %v1545_v35 = vpack.c.bf16 %v687_v33, %v684_v32  ;;  %v683_v36 = vld [vmem:[%s2352_s4 + $0x270] sm:$0xff]  ;;  %v690_v38 = vld [vmem:[%s2352_s4 + $0x2a8] sm:$0xff]  ;;  %v693_v39 = vld [vmem:[%s2352_s4 + $0x2c0] sm:$0xff] }
  0x32   : > { %1512 = vmatpush1.bf16.msra.mxu1 %v1511_v49  ;;  %v1547_v40 = vpack.c.bf16 %v686_v37, %v683_v36  ;;  %v1549_v41 = vpack.c.bf16 %v693_v39, %v690_v38  ;;  %v689_v42 = vld [vmem:[%s2352_s4 + $0x2a0] sm:$0xff]  ;;  %v692_v43 = vld [vmem:[%s2352_s4 + $0x2b8] sm:$0xff]  ;;  %v699_v45 = vld [vmem:[%s2352_s4 + $0x2f0] sm:$0xff] }
  0x33   : > { %1514 = vmatprep.subr.bf16.mxu1 %v1513_v50  ;;  %v696_v44 = vld [vmem:[%s2352_s4 + $0x2d8] sm:$0xff]  ;;  %v1551_v46 = vpack.c.bf16 %v692_v43, %v689_v42  ;;  %v695_v48 = vld [vmem:[%s2352_s4 + $0x2d0] sm:$0xff]  ;;  %v698_v49 = vld [vmem:[%s2352_s4 + $0x2e8] sm:$0xff] }
  0x34   : > { %v1553_v47 = vpack.c.bf16 %v699_v45, %v696_v44  ;;  %v1555_v50 = vpack.c.bf16 %v698_v49, %v695_v48  ;;  %v655_v57 = vld [vmem:[%s2352_s4 + $0x190] sm:$0xff]  ;;  %v658_v58 = vld [vmem:[%s2352_s4 + $0x1a8] sm:$0xff]  ;;  %v445_v60 = vld [vmem:[%s2350_s2] sm:$0xff] }
  0x35   : > { %v1589_v63 = vpack.c.bf16 %v658_v58, %v655_v57  ;;  %v446_v0 = vld [vmem:[%s2350_s2 + $0x8] sm:$0xff]  ;;  %v607_v1 = vld [vmem:[%s2352_s4 + $0x10] sm:$0xff]  ;;  %v613_v8 = vld [vmem:[%s2352_s4 + $0x40] sm:$0xff] }
  0x36   : > { %1516 = vmatpush1.bf16.msra.mxu1 %v1515_v55  ;;  %v610_v2 = vld [vmem:[%s2352_s4 + $0x28] sm:$0xff]  ;;  %v616_v9 = vld [vmem:[%s2352_s4 + $0x58] sm:$0xff]  ;;  %v619_v14 = vld [vmem:[%s2352_s4 + $0x70] sm:$0xff] }
  0x37   : > { %1518 = vmatprep.subr.bf16.mxu1 %v1517_v56  ;;  %v1591_v5 = vpack.c.bf16 %v610_v2, %v607_v1  ;;  %v1595_v12 = vpack.c.bf16 %v616_v9, %v613_v8  ;;  %v622_v15 = vld [vmem:[%s2352_s4 + $0x88] sm:$0xff]  ;;  %v625_v20 = vld [vmem:[%s2352_s4 + $0xa0] sm:$0xff]  ;;  %v628_v21 = vld [vmem:[%s2352_s4 + $0xb8] sm:$0xff] }
  0x38   : > { %v1599_v18 = vpack.c.bf16 %v622_v15, %v619_v14  ;;  %v1603_v24 = vpack.c.bf16 %v628_v21, %v625_v20  ;;  %v631_v26 = vld [vmem:[%s2352_s4 + $0xd0] sm:$0xff]  ;;  %v634_v27 = vld [vmem:[%s2352_s4 + $0xe8] sm:$0xff]  ;;  %v637_v32 = vld [vmem:[%s2352_s4 + $0x100] sm:$0xff] }
  0x39   : > { %v1607_v30 = vpack.c.bf16 %v634_v27, %v631_v26  ;;  %v640_v33 = vld [vmem:[%s2352_s4 + $0x118] sm:$0xff]  ;;  %v643_v38 = vld [vmem:[%s2352_s4 + $0x130] sm:$0xff]  ;;  %v646_v39 = vld [vmem:[%s2352_s4 + $0x148] sm:$0xff] }
  0x3a   : > { %1520 = vmatpush1.bf16.msra.mxu1 %v1519_v61  ;;  %v1611_v36 = vpack.c.bf16 %v640_v33, %v637_v32  ;;  %v1615_v42 = vpack.c.bf16 %v646_v39, %v643_v38  ;;  %v649_v44 = vld [vmem:[%s2352_s4 + $0x160] sm:$0xff]  ;;  %v652_v45 = vld [vmem:[%s2352_s4 + $0x178] sm:$0xff]  ;;  %v703_v49 = vld [vmem:[%s2352_s4 + $0x310] sm:$0xff] }
  0x3b   : > { %1522 = vmatprep.subr.bf16.mxu1 %v1521_v62  ;;  %v705_v48 = vld [vmem:[%s2352_s4 + $0x320] sm:$0xff]  ;;  %v704_v58 = vld [vmem:[%s2352_s4 + $0x318] sm:$0xff]  ;;  %v710_v8 = vld [vmem:[%s2352_s4 + $0x348] sm:$0xff] }
  0x3c   : > { %v701_v57 = vld [vmem:[%s2352_s4 + $0x300] sm:$0xff]  ;;  %v714_v9 = vld [vmem:[%s2352_s4 + $0x368] sm:$0xff]  ;;  %v723_v21 = vld [vmem:[%s2352_s4 + $0x3b0] sm:$0xff] }
  0x3d   : > { %v1559_v2 = vpack.c.bf16 %v704_v58, %v701_v57  ;;  %v729_v32 = vld [vmem:[%s2352_s4 + $0x3e0] sm:$0xff]  ;;  %v727_v33 = vld [vmem:[%s2352_s4 + $0x3d0] sm:$0xff]  ;;  %v728_v39 = vld [vmem:[%s2352_s4 + $0x3d8] sm:$0xff] }
  0x3e   : > { %1524 = vmatpush1.bf16.msra.mxu1 %v1523_v3  ;;  %v661_v3 = vld [vmem:[%s2352_s4 + $0x1c0] sm:$0xff] }
  0x3f   : > { %1526 = vmatprep.subr.bf16.mxu1 %v1525_v4  ;;  %v664_v4 = vld [vmem:[%s2352_s4 + $0x1d8] sm:$0xff]  ;;  %v725_v38 = vld [vmem:[%s2352_s4 + $0x3c0] sm:$0xff] }
  0x40   : > { %v1593_v7 = vpack.c.bf16 %v664_v4, %v661_v3 }
  0x42   : > { %1528 = vmatpush1.bf16.msra.mxu1 %v1527_v10  ;;  %v667_v10 = vld [vmem:[%s2352_s4 + $0x1f0] sm:$0xff] }
  0x43   : > { %1530 = vmatprep.subr.bf16.mxu1 %v1529_v11  ;;  %v670_v11 = vld [vmem:[%s2352_s4 + $0x208] sm:$0xff] }
  0x44   : > { %v1597_v13 = vpack.c.bf16 %v670_v11, %v667_v10  ;;  %v717_v10 = vld [vmem:[%s2352_s4 + $0x380] sm:$0xff]  ;;  %v715_v11 = vld [vmem:[%s2352_s4 + $0x370] sm:$0xff] }
  0x45   : > { %v1565_v15 = vpack.c.bf16 %v717_v10, %v714_v9  ;;  %v746_v9 = vld [vmem:[%s2352_s4 + $0x468] sm:$0xff] }
  0x46   : > { %1532 = vmatpush1.bf16.msra.mxu1 %v1531_v16  ;;  %v673_v16 = vld [vmem:[%s2352_s4 + $0x220] sm:$0xff] }
  0x47   : > { %1534 = vmatprep.subr.bf16.mxu1 %v1533_v17  ;;  %v676_v17 = vld [vmem:[%s2352_s4 + $0x238] sm:$0xff] }
  0x48   : > { %v1601_v19 = vpack.c.bf16 %v676_v17, %v673_v16  ;;  %v713_v17 = vld [vmem:[%s2352_s4 + $0x360] sm:$0xff] }
  0x4a   : > { %1536 = vmatpush1.bf16.msra.mxu1 %v1535_v22  ;;  %v679_v22 = vld [vmem:[%s2352_s4 + $0x250] sm:$0xff] }
  0x4b   : > { %1538 = vmatprep.subr.bf16.mxu1 %v1537_v23  ;;  %v682_v23 = vld [vmem:[%s2352_s4 + $0x268] sm:$0xff] }
  0x4c   : > { %v1605_v25 = vpack.c.bf16 %v682_v23, %v679_v22  ;;  %v721_v22 = vld [vmem:[%s2352_s4 + $0x3a0] sm:$0xff]  ;;  %v724_v23 = vld [vmem:[%s2352_s4 + $0x3b8] sm:$0xff] }
  0x4d   : > { %v1633_v27 = vpack.c.bf16 %v724_v23, %v721_v22 }
  0x4e   : > { %1540 = vmatpush1.bf16.msra.mxu1 %v1539_v28  ;;  %v685_v28 = vld [vmem:[%s2352_s4 + $0x280] sm:$0xff] }
  0x4f   : > { %1542 = vmatprep.subr.bf16.mxu1 %v1541_v29  ;;  %v688_v29 = vld [vmem:[%s2352_s4 + $0x298] sm:$0xff] }
  0x50   : > { %v1609_v31 = vpack.c.bf16 %v688_v29, %v685_v28  ;;  %v719_v28 = vld [vmem:[%s2352_s4 + $0x390] sm:$0xff]  ;;  %v722_v29 = vld [vmem:[%s2352_s4 + $0x3a8] sm:$0xff] }
  0x52   : > { %1544 = vmatpush1.bf16.msra.mxu1 %v1543_v34  ;;  %v691_v34 = vld [vmem:[%s2352_s4 + $0x2b0] sm:$0xff] }
  0x53   : > { %1546 = vmatprep.subr.bf16.mxu1 %v1545_v35  ;;  %v694_v35 = vld [vmem:[%s2352_s4 + $0x2c8] sm:$0xff] }
  0x54   : > { %v1613_v37 = vpack.c.bf16 %v694_v35, %v691_v34  ;;  %v730_v34 = vld [vmem:[%s2352_s4 + $0x3e8] sm:$0xff]  ;;  %v1571_v35 = vpack.c.bf16 %v722_v29, %v719_v28 }
  0x56   : > { %1548 = vmatpush1.bf16.msra.mxu1 %v1547_v40  ;;  %v697_v40 = vld [vmem:[%s2352_s4 + $0x2e0] sm:$0xff] }
  0x57   : > { %1550 = vmatprep.subr.bf16.mxu1 %v1549_v41  ;;  %v700_v41 = vld [vmem:[%s2352_s4 + $0x2f8] sm:$0xff] }
  0x58   : > { %v1617_v43 = vpack.c.bf16 %v700_v41, %v697_v40  ;;  %v732_v40 = vld [vmem:[%s2352_s4 + $0x3f8] sm:$0xff]  ;;  %v735_v41 = vld [vmem:[%s2352_s4 + $0x410] sm:$0xff] }
  0x5a   : > { %1552 = vmatpush1.bf16.msra.mxu1 %v1551_v46  ;;  %v1619_v46 = vpack.c.bf16 %v652_v45, %v649_v44  ;;  %v1575_v44 = vpack.c.bf16 %v728_v39, %v725_v38  ;;  %v1577_v45 = vpack.c.bf16 %v735_v41, %v732_v40 }
  0x5b   : > { %1554 = vmatprep.subr.bf16.mxu1 %v1553_v47  ;;  %v702_v47 = vld [vmem:[%s2352_s4 + $0x308] sm:$0xff] }
  0x5e   : > { %1556 = vmatpush1.bf16.msra.mxu1 %v1555_v50  ;;  %v1557_v50 = vpack.c.bf16 %v705_v48, %v702_v47  ;;  %v731_v47 = vld [vmem:[%s2352_s4 + $0x3f0] sm:$0xff]  ;;  %v734_v48 = vld [vmem:[%s2352_s4 + $0x408] sm:$0xff] }
  0x5f   : > { %v1579_v57 = vpack.c.bf16 %v734_v48, %v731_v47 }
  0x60   : > { %1558 = vmatprep.subr.bf16.mxu1 %v1557_v50  ;;  %v741_v50 = vld [vmem:[%s2352_s4 + $0x440] sm:$0xff] }
  0xfb   : > { %v2019_v51 = vpop.f32.mrb[0].mxu0 }
  0xfc   : > { %v2021_v52 = vpop.f32.mrb[1].mxu0 }
  0xff   : > { %v2023_v53 = vpop.f32.mrb[2].mxu0 }
 0x100   : > { %v1487_v54 = vpack.c.bf16 %v2023_v53, %v2019_v51  ;;  %v2027_v55 = vpop.f32.mrb[3].mxu0 }
 0x101   : > { %v1485_v56 = vpack.c.bf16 %v2027_v55, %v2021_v52 }
 0x103   : > { %1486 = vmatprep.subr.bf16.mxu0 %v1485_v56  ;;  %v2037_v59 = vpop.f32.mrb[4].mxu0 }
 0x104   : > { %1488 = vmatpush1.bf16.msra.mxu0 %v1487_v54  ;;  %v2042_v61 = vpop.f32.mrb[5].mxu0  ;;  %v706_v54 = vld [vmem:[%s2352_s4 + $0x328] sm:$0xff] }
 0x105   : > { %v1489_v62 = vpack.c.bf16 %v2037_v59, %v2042_v61  ;;  %v1621_v56 = vpack.c.bf16 %v706_v54, %v703_v49  ;;  %v738_v49 = vld [vmem:[%s2352_s4 + $0x428] sm:$0xff]  ;;  %v739_v54 = vld [vmem:[%s2352_s4 + $0x430] sm:$0xff] }
 0x106   : > { %v1581_v58 = vpack.c.bf16 %v741_v50, %v738_v49 }
 0x107   : > { %1340 = vmatmul.mubr.msk.f32.vlgmr.msra.gmra.mrb[6].mxu0 %vm286_vm0, %v445_v60  ;;  %1490 = vmatprep.subr.bf16.mxu0 %v1489_v62 }
 0x108   : > { %523 = vmatprep.mubr.f32.mxu0 %v1732_v6  ;;  %1492 = vmatpush3.bf16.msra.mxu0 %v1489_v62  ;;  %v711_v62 = vld [vmem:[%s2352_s4 + $0x350] sm:$0xff] }
 0x109   : > { %1590 = vmatprep.subr.bf16.mxu0 %v1589_v63  ;;  %v709_v63 = vld [vmem:[%s2352_s4 + $0x340] sm:$0xff] }
 0x10b   : > { %1341 = vmatmul.mubr.msk.f32.gmra.mrb[8].mxu0 %vm286_vm0, %v446_v0 }
 0x10c   : > { %1432 = vmatprep.mubr.msk.f32.mxu0 %vm286_vm0, %v445_v60  ;;  %v708_v60 = vld [vmem:[%s2352_s4 + $0x338] sm:$0xff] }
 0x10d   : > { %v1561_v4 = vpack.c.bf16 %v711_v62, %v708_v60  ;;  %v737_v62 = vld [vmem:[%s2352_s4 + $0x420] sm:$0xff] }
 0x10f   : > { %1433 = vmatmul.mubr.msk.f32.vlgmr.msra.gmra.mrb[10].mxu0 %vm286_vm0, %v446_v0  ;;  %v712_v0 = vld [vmem:[%s2352_s4 + $0x358] sm:$0xff] }
 0x110   : > { %1592 = vmatpush3.bf16.msra.mxu0 %v1591_v5  ;;  %v1625_v5 = vpack.c.bf16 %v712_v0, %v709_v63  ;;  %v740_v63 = vld [vmem:[%s2352_s4 + $0x438] sm:$0xff] }
 0x111   : > { %1594 = vmatprep.subr.bf16.mxu0 %v1593_v7  ;;  %v707_v7 = vld [vmem:[%s2352_s4 + $0x330] sm:$0xff]  ;;  %v744_v0 = vld [vmem:[%s2352_s4 + $0x458] sm:$0xff] }
 0x114   : > { %1596 = vmatpush3.bf16.msra.mxu0 %v1595_v12  ;;  %v718_v12 = vld [vmem:[%s2352_s4 + $0x388] sm:$0xff] }
 0x115   : > { %1598 = vmatprep.subr.bf16.mxu0 %v1597_v13  ;;  %v1563_v13 = vpack.c.bf16 %v710_v8, %v707_v7  ;;  %v1629_v16 = vpack.c.bf16 %v718_v12, %v715_v11  ;;  %v743_v8 = vld [vmem:[%s2352_s4 + $0x450] sm:$0xff] }
 0x116   : > { %v1587_v10 = vpack.c.bf16 %v746_v9, %v743_v8 }
 0x118   : > { %1600 = vmatpush3.bf16.msra.mxu0 %v1599_v18  ;;  %v716_v18 = vld [vmem:[%s2352_s4 + $0x378] sm:$0xff] }
 0x119   : > { %1602 = vmatprep.subr.bf16.mxu0 %v1601_v19  ;;  %v720_v19 = vld [vmem:[%s2352_s4 + $0x398] sm:$0xff] }
 0x11a   : > { %v1569_v26 = vpack.c.bf16 %v723_v21, %v720_v19  ;;  %v749_v19 = vld [vmem:[%s2353_s5] sm:$0xff]  ;;  %v750_v21 = vld [vmem:[%s2353_s5 + $0x8] sm:$0xff] }
 0x11c   : > { %1604 = vmatpush3.bf16.msra.mxu0 %v1603_v24  ;;  %v1567_v24 = vpack.c.bf16 %v716_v18, %v713_v17  ;;  %v754_v17 = vld [vmem:[%s2353_s5 + $0x28] sm:$0xff]  ;;  %v751_v18 = vld [vmem:[%s2353_s5 + $0x10] sm:$0xff] }
 0x11d   : > { %1606 = vmatprep.subr.bf16.mxu0 %v1605_v25 }
 0x120   : > { %1608 = vmatpush3.bf16.msra.mxu0 %v1607_v30  ;;  %v726_v30 = vld [vmem:[%s2352_s4 + $0x3c8] sm:$0xff] }
 0x121   : > { %1610 = vmatprep.subr.bf16.mxu0 %v1609_v31 }
 0x124   : > { %1612 = vmatpush3.bf16.msra.mxu0 %v1611_v36  ;;  %v1573_v36 = vpack.c.bf16 %v729_v32, %v726_v30  ;;  %v753_v32 = vld [vmem:[%s2353_s5 + $0x20] sm:$0xff] }
 0x125   : > { %1614 = vmatprep.subr.bf16.mxu0 %v1613_v37  ;;  %v1637_v37 = vpack.c.bf16 %v730_v34, %v727_v33 }
 0x128   : > { %1616 = vmatpush3.bf16.msra.mxu0 %v1615_v42  ;;  %v733_v42 = vld [vmem:[%s2352_s4 + $0x400] sm:$0xff] }
 0x129   : > { %1618 = vmatprep.subr.bf16.mxu0 %v1617_v43  ;;  %v736_v43 = vld [vmem:[%s2352_s4 + $0x418] sm:$0xff] }
 0x12c   : > { %1620 = vmatpush3.bf16.msra.mxu0 %v1619_v46  ;;  %v1641_v46 = vpack.c.bf16 %v736_v43, %v733_v42 }
 0x12d   : > { %1622 = vmatprep.subr.bf16.mxu0 %v1621_v56 }
 0x1da   : > { %v519_v1 = vpop.f32.mrb[6].mxu0 }
 0x1db   : > { %v521_v3 = vpop.f32.mrb[7].mxu0 }
 0x1dc   : > { %819 = vmatprep.mubr.f32.mxu1 %v521_v3  ;;  %973 = vmatprep.mubr.f32.mxu0 %v521_v3  ;;  %v748_v3 = vld [vmem:[%s2352_s4 + $0x478] sm:$0xff] }
 0x1dd   : > { %820 = vmatmul.mubr.f32.vlgmr.msra.gmra.mrb[0].mxu1 %v519_v1  ;;  %974 = vmatmul.mubr.f32.vlgmr.msra.gmra.mrb[12].mxu0 %v519_v1  ;;  %v747_v1 = vld [vmem:[%s2352_s4 + $0x470] sm:$0xff] }
 0x1de   : > { %1560 = vmatpush1.bf16.msra.mxu1 %v1559_v2  ;;  %1624 = vmatpush3.bf16.msra.mxu0 %v1621_v56  ;;  %v525_v14 = vpop.f32.mrb[8].mxu0  ;;  %v742_v56 = vld [vmem:[%s2352_s4 + $0x448] sm:$0xff]  ;;  %v745_v2 = vld [vmem:[%s2352_s4 + $0x460] sm:$0xff] }
 0x1df   : > { %1562 = vmatprep.subr.bf16.mxu1 %v1561_v4  ;;  %1626 = vmatprep.subr.bf16.mxu0 %v1625_v5  ;;  %v527_v20 = vpop.f32.mrb[9].mxu0  ;;  %v1645_v60 = vpack.c.bf16 %v742_v56, %v739_v54  ;;  %v1583_v4 = vpack.c.bf16 %v740_v63, %v737_v62  ;;  %v1649_v7 = vpack.c.bf16 %v748_v3, %v745_v2 }
 0x1e0   : > { %978 = vmatprep.mubr.f32.mxu0 %v527_v20  ;;  %825 = vmatprep.mubr.f32.mxu1 %v527_v20 }
 0x1e1   : > { %979 = vmatmul.mubr.f32.gmra.mrb[14].mxu0 %v525_v14  ;;  %826 = vmatmul.mubr.f32.gmra.mrb[2].mxu1 %v525_v14 }
 0x1e2   : > { %1564 = vmatpush1.bf16.msra.mxu1 %v1563_v13  ;;  %1628 = vmatpush3.bf16.msra.mxu0 %v1625_v5  ;;  %v2210_v25 = vpop.f32.mrb[10].mxu0  ;;  %v1585_v5 = vpack.c.bf16 %v747_v1, %v744_v0 }
 0x1e3   : > { %1566 = vmatprep.subr.bf16.mxu1 %v1565_v15  ;;  %1630 = vmatprep.subr.bf16.mxu0 %v1629_v16  ;;  %v596_v31 = vpop.f32.mrb[11].mxu0 }
 0x1e4   : > { %896 = vmatprep.mubr.f32.mxu1 %v1732_v6  ;;  %1467 = vmatprep.mubr.f32.mxu0 %v596_v31 }
 0x1e6   : > { %1568 = vmatpush1.bf16.msra.mxu1 %v1567_v24  ;;  %1632 = vmatpush3.bf16.msra.mxu0 %v1629_v16 }
 0x1e7   : > { %1570 = vmatprep.subr.bf16.mxu1 %v1569_v26  ;;  %1634 = vmatprep.subr.bf16.mxu0 %v1633_v27 }
 0x1ea   : > { %1572 = vmatpush1.bf16.msra.mxu1 %v1571_v35  ;;  %1636 = vmatpush3.bf16.msra.mxu0 %v1633_v27 }
 0x1eb   : > { %1574 = vmatprep.subr.bf16.mxu1 %v1573_v36  ;;  %1638 = vmatprep.subr.bf16.mxu0 %v1637_v37 }
 0x1ee   : > { %1576 = vmatpush1.bf16.msra.mxu1 %v1575_v44  ;;  %1640 = vmatpush3.bf16.msra.mxu0 %v1637_v37 }
 0x1ef   : > { %1578 = vmatprep.subr.bf16.mxu1 %v1577_v45  ;;  %1642 = vmatprep.subr.bf16.mxu0 %v1641_v46 }
 0x1f2   : > { %1580 = vmatpush1.bf16.msra.mxu1 %v1579_v57  ;;  %1644 = vmatpush3.bf16.msra.mxu0 %v1641_v46 }
 0x1f3   : > { %1582 = vmatprep.subr.bf16.mxu1 %v1581_v58  ;;  %1646 = vmatprep.subr.bf16.mxu0 %v1645_v60 }
 0x1f6   : > { %1584 = vmatpush1.bf16.msra.mxu1 %v1583_v4  ;;  %1648 = vmatpush3.bf16.msra.mxu0 %v1645_v60 }
 0x1f7   : > { %1586 = vmatprep.subr.bf16.mxu1 %v1585_v5  ;;  %1650 = vmatprep.subr.bf16.mxu0 %v1649_v7 }
 0x1fa   : > { %1588 = vmatpush1.bf16.msra.mxu1 %v1587_v10  ;;  %1652 = vmatpush3.bf16.msra.mxu0 %v1649_v7 }
 0x1fd   : > { %897 = vmatmul.mubr.f32.vlgmr.msra.gmra.mrb[0].mxu1 %v596_v31  ;;  %1468 = vmatmul.mubr.f32.vlgmr.msra.gmra.mrb[16].mxu0 %v2210_v25  ;;  %v752_v31 = vld [vmem:[%s2353_s5 + $0x18] sm:$0xff] }
 0x1fe   : > { %902 = vmatprep.mubr.f32.mxu1 %v1732_v6  ;;  %1143 = vmatprep.mubr.f32.mxu0 %v1732_v6 }
 0x201   : > { %903 = vmatmul.mubr.f32.gmra.mrb[2].mxu1 %v2210_v25 }
 0x2b0   : > { %v1393_v11 = vpop.f32.mrb[12].mxu0 }
 0x2b1   : > { %v1394_v12 = vpop.f32.mrb[13].mxu0 }
 0x2b2   : > { %v1395_v13 = vadd.f32 %v1394_v12, %v1393_v11 }
 0x2b4   : > { %v1396_v14 = vpop.f32.mrb[14].mxu0  ;;  %v976_v24 = vadd.f32 %v1395_v13, %v751_v18 }
 0x2b5   : > { %v1397_v15 = vpop.f32.mrb[15].mxu0 }
 0x2b6   : > { %v1398_v16 = vadd.f32 %v1397_v15, %v1396_v14 }
 0x2b8   : > { %v981_v20 = vadd.f32 %v1398_v16, %v754_v17 }
 0x2d0   : > { %v898_v22 = vpop.f32.mrb[0].mxu1  ;;  %v1469_v23 = vpop.f32.mrb[16].mxu0 }
 0x2d1   : > { %v1661_v25 = vadd.f32 %v898_v22, %v749_v19  ;;  %v1056_v26 = vadd.f32 %v1469_v23, %v981_v20  ;;  %v900_v27 = vpop.f32.mrb[1].mxu1  ;;  %v1050_v28 = vpop.f32.mrb[17].mxu0 }
 0x2d2   : > { %v1662_v29 = vadd.f32 %v900_v27, %v750_v21  ;;  %v1051_v30 = vadd.f32 %v1050_v28, %v976_v24 }
 0x2d3   : > { %1696 = vtanh.f32 %v1661_v25 }
 0x2d4   : > { %1698 = vtanh.f32 %v1056_v26  ;;  %v904_v33 = vpop.f32.mrb[2].mxu1 }
 0x2d5   : > { %1700 = vtanh.f32 %v1662_v29  ;;  %v1663_v34 = vadd.f32 %v904_v33, %v752_v31  ;;  %v906_v35 = vpop.f32.mrb[3].mxu1 }
 0x2d6   : > { %1702 = vtanh.f32 %v1051_v30  ;;  %v1664_v36 = vadd.f32 %v906_v35, %v753_v32 }
 0x2d7   : > { %1704 = vtanh.f32 %v1663_v34 }
 0x2d8   : > { %1706 = vtanh.f32 %v1664_v36 }
 0x2dd   : > { %v1697_v37 = vpop.eup %1696 }
 0x2de   : > { %v1699_v38 = vpop.eup %1698  ;;  %v1065_v39 = vadd.f32 %v1697_v37, %v2019_v51  ;;  %v1071_v51 = vld [vmem:[%s2351_s3] sm:$0xff] }
 0x2df   : > { %v1701_v40 = vpop.eup %1700  ;;  %v1070_v41 = vadd.f32 %v1699_v38, %v2037_v59 }
 0x2e0   : > { %v1703_v42 = vpop.eup %1702  ;;  %v1066_v43 = vadd.f32 %v1701_v40, %v2021_v52  ;;  %v1072_v52 = vld [vmem:[%s2351_s3 + $0x8] sm:$0xff] }
 0x2e1   : > { %v1705_v44 = vpop.eup %1704  ;;  %v1067_v45 = vadd.f32 %v1703_v42, %v2042_v61 }
 0x2e2   : > { %v1707_v46 = vpop.eup %1706  ;;  %v1068_v47 = vadd.f32 %v1705_v44, %v2023_v53 }
 0x2e3   : > { %v1069_v48 = vadd.f32 %v1707_v46, %v2027_v55  ;;  %v1657_v49 = vpack.c.bf16 %v1070_v41, %v1067_v45 }
 0x2e4   : > { %v1655_v50 = vpack.c.bf16 %v1068_v47, %v1065_v39 }
 0x2e5   : > { %v1653_v54 = vpack.c.bf16 %v1069_v48, %v1066_v43 }
 0x2e7   : > { %1654 = vmatprep.subr.bf16.mxu0 %v1653_v54 }
 0x2e8   : > { %1656 = vmatpush1.bf16.msra.mxu0 %v1655_v50 }
 0x2e9   : > { %1658 = vmatprep.subr.bf16.mxu0 %v1657_v49 }
 0x2eb   : > { %1344 = vmatmul.mubr.msk.f32.vlgmr.msra.gmra.mrb[18].mxu0 %vm286_vm0, %v1071_v51 }
 0x2ec   : > { %1660 = vmatpush3.bf16.msra.mxu0 %v1657_v49  ;;  %1149 = vmatprep.mubr.f32.mxu0 %v1732_v6 }
 0x2ef   : > { %1345 = vmatmul.mubr.msk.f32.gmra.mrb[20].mxu0 %vm286_vm0, %v1072_v52 }
 0x2f0   : > { %1474 = vmatprep.mubr.msk.f32.mxu0 %vm286_vm0, %v1071_v51 }
 0x2f3   : > { %1475 = vmatmul.mubr.msk.f32.vlgmr.msra.gmra.mrb[22].mxu0 %vm286_vm0, %v1072_v52 }
 0x3be   : > { %v1145_v53 = vpop.f32.mrb[18].mxu0 }
 0x3bf   : > { %1231 = vst [vmem:[%s275_s26] sm:$0xff] %v1145_v53  ;;  %v1147_v55 = vpop.f32.mrb[19].mxu0 }
 0x3c0   : > { %1232 = vst [vmem:[%s275_s26 + $0x8] sm:$0xff] %v1147_v55 }
 0x3c2   : > { %v1151_v59 = vpop.f32.mrb[20].mxu0  ;;  %1243 = sbr.rel (!%p1798_p5) target bundleno = 977 (0x3d1), region = 71 }
 0x3c3   : > { %1234 = vst [vmem:[%s275_s26 + $0x18] sm:$0xff] %v1151_v59  ;;  %v1153_v61 = vpop.f32.mrb[21].mxu0 }
 0x3c4   : > { %1235 = vst [vmem:[%s275_s26 + $0x20] sm:$0xff] %v1153_v61 }
 0x3c6   : > { %v1476_v6 = vpop.f32.mrb[22].mxu0  ;;  %v1259_v57 = vld [vmem:[%s275_s26] sm:$0xff] (%p1798_p5) }
 0x3c7   : > { %1236 = vst [vmem:[%s275_s26 + $0x28] sm:$0xff] %v1476_v6  ;;  %v1222_v56 = vpop.f32.mrb[23].mxu0  ;;  %v1261_v58 = vld [vmem:[%s275_s26 + $0x8] sm:$0xff] (%p1798_p5)  ;;  %1260 = vst [vmem:[%s1246_s7] sm:$0xff] (%p1798_p5), %v1259_v57 }
 0x3c8   : > { %1233 = vst [vmem:[%s275_s26 + $0x10] sm:$0xff] %v1222_v56  ;;  %1262 = vst [vmem:[%s1246_s7 + $0x8] sm:$0xff] (%p1798_p5), %v1261_v58 }
 0x3ca   : > { %v1265_v62 = vld [vmem:[%s275_s26 + $0x18] sm:$0xff] }
 0x3cb   : > { %v1267_v63 = vld [vmem:[%s275_s26 + $0x20] sm:$0xff]  ;;  %1266 = vst [vmem:[%s1246_s7 + $0x30] sm:$0xff] %v1265_v62 }
 0x3cc   : > { %1268 = vst [vmem:[%s1246_s7 + $0x38] sm:$0xff] %v1267_v63 }
 0x3ce   : > { %v1269_v0 = vld [vmem:[%s275_s26 + $0x28] sm:$0xff] }
 0x3cf   : > { %v1263_v60 = vld [vmem:[%s275_s26 + $0x10] sm:$0xff]  ;;  %1270 = vst [vmem:[%s1246_s7 + $0x40] sm:$0xff] %v1269_v0 }
 0x3d0   : > { %1264 = vst [vmem:[%s1246_s7 + $0x10] sm:$0xff] %v1263_v60 }
 0x3d1 PF: > { %p13_p10 = scmp.ge.s32.totalorder %s1785_s25, 4   ;;  %s2356_s21 = smov %s1726_s22 }
 0x3d2   : > { %s2357_s22 = smov %s1796_s28  ;;  %s2358_s23 = smov %s1785_s25 }
 0x3d3   :  { %15 = sbr.rel (!%p13_p10) target bundleno = 2 (0x2), region = 125 }

</bundles_post_ra>
